<compile_context>
chip_gen: v6e
topology: v6e:2x2x1
jax: 0.10.0
libtpu: 0.0.40
codegen_flags: <defaults>
</compile_context>

<pallas_src>
import functools

import jax
import jax.numpy as jnp
from jax.experimental import pallas as pl
from jax.experimental.pallas import tpu as pltpu


def _round_up(a, b):
    return -(-a // b) * b


def _addcoords_kernel(x_ref, o_ref, *, C, H, W, hw_tile, Bn):
    # x_ref: (Bn, C,     hw_tile)   view of x reshaped to (N, C, H*W)
    # o_ref: (Bn, C + 2, hw_tile)
    # Pass-through channels: one lane-dense copy.
    o_ref[:, :C, :] = x_ref[...]

    # Coordinate channels on the VPU (free in a DMA-bound kernel).
    j = pl.program_id(1)  # hw-tile index
    lane = jax.lax.broadcasted_iota(jnp.int32, (1, hw_tile), 1)
    flat = (lane + j * hw_tile).astype(jnp.float32)   # flat index into H*W
    yy_i = jnp.floor(flat / jnp.float32(W))           # row index (varies along H)
    xx_i = flat - yy_i * jnp.float32(W)               # col index (varies along W)
    # Same normalization as the torch reference (H==1 / W==1 -> inf/nan, as in torch).
    yy = (yy_i / jnp.float32(H - 1)) * 2.0 - 1.0
    xx = (xx_i / jnp.float32(W - 1)) * 2.0 - 1.0
    o_ref[:, C, :] = jnp.broadcast_to(yy, (Bn, hw_tile)).astype(o_ref.dtype)
    o_ref[:, C + 1, :] = jnp.broadcast_to(xx, (Bn, hw_tile)).astype(o_ref.dtype)


def _vmem_capacity_bytes():
    """Physical VMEM per core; conservative fallback (v7x = 64 MiB per TC)."""
    try:
        cap = getattr(pltpu.get_tpu_info(), "vmem_capacity_bytes", None)
        if cap:
            return int(cap)
    except Exception:
        pass
    return 64 << 20


def _pick_blocks(N, C, HW, itemsize):
    """Pick (Bn, hw_tile, vmem_limit_bytes) for the (N, C, HW) layout."""
    capacity = _vmem_capacity_bytes()
    # Double-buffered budget for one grid step's x + out blocks:
    # ~24 MiB on 128 MiB parts (v5e/v6e), ~16 MiB on 64 MiB v7x.
    budget = min(24 << 20, capacity // 4)

    # Honest bytes per lane column: sublane dims pad to multiples of 8, and
    # each stream is double-buffered by the Pallas pipeline.
    c_pad = _round_up(C, 8)          # x block sublanes
    o_pad = _round_up(C + 2, 8)      # out block sublanes
    per_lane = 2 * (c_pad + o_pad) * itemsize

    if HW <= 128:
        hw_tile = HW                               # full-extent lane block (always legal)
    else:
        target = max(128, (budget // per_lane) // 128 * 128)
        hw_tile = min(target, _round_up(HW, 128))  # no point tiling past HW
    num_hw = -(-HW // hw_tile)

    # Pack extra batch rows per block if budget allows (small C / small HW
    # means fewer 0.35 us grid steps).
    Bn = max(1, min(N, budget // (hw_tile * per_lane)))

    # Keep >= 2 "parallel" grid steps so both v7x TensorCores get work.
    if num_hw == 1:
        if N >= 2:
            Bn = min(Bn, -(-N // 2))
        elif HW > 128:
            hw_tile = max(128, (HW // 2) // 128 * 128)
            num_hw = -(-HW // hw_tile)

    footprint = 2 * Bn * (c_pad + o_pad) * hw_tile * itemsize
    vmem_limit = int(min(capacity, footprint + (8 << 20)))   # + headroom
    return Bn, hw_tile, vmem_limit


def add_coords(x):
    """x: (N, C, H, W) -> (N, C+2, H, W), channels = [x, yy, xx]."""
    N, C, H, W = x.shape
    HW = H * W
    itemsize = jnp.dtype(x.dtype).itemsize

    x_flat = x.reshape(N, C, HW)  # metadata-only for contiguous NCHW

    Bn, hw_tile, vmem_limit = _pick_blocks(N, C, HW, itemsize)
    grid = (-(-N // Bn), -(-HW // hw_tile))

    kernel = functools.partial(
        _addcoords_kernel, C=C, H=H, W=W, hw_tile=hw_tile, Bn=Bn)

    # Pure-bandwidth op: read N*C*HW, write N*(C+2)*HW.
    bytes_accessed = itemsize * HW * N * (2 * C + 2)

    out_flat = pl.pallas_call(
        kernel,
        out_shape=jax.ShapeDtypeStruct((N, C + 2, HW), x.dtype),
        grid_spec=pltpu.PrefetchScalarGridSpec(
            num_scalar_prefetch=0,
            grid=grid,
            in_specs=[pl.BlockSpec((Bn, C, hw_tile), lambda n, j: (n, 0, j))],
            out_specs=pl.BlockSpec((Bn, C + 2, hw_tile), lambda n, j: (n, 0, j)),
        ),
        compiler_params=pltpu.CompilerParams(
            dimension_semantics=("parallel", "parallel"),
            vmem_limit_bytes=vmem_limit,
        ),
        cost_estimate=pl.CostEstimate(
            flops=0, transcendentals=0, bytes_accessed=int(bytes_accessed)),
    )(x_flat)

    return out_flat.reshape(N, C + 2, H, W)


def add_coords_ref(x):
    """Pure-JAX reference mirroring the PyTorch semantics."""
    N, C, H, W = x.shape
    yy = jnp.arange(H, dtype=jnp.float32)[None, None, :, None]
    xx = jnp.arange(W, dtype=jnp.float32)[None, None, None, :]
    yy = (yy / (H - 1)) * 2.0 - 1.0
    xx = (xx / (W - 1)) * 2.0 - 1.0
    yy = jnp.broadcast_to(yy, (N, 1, H, W)).astype(x.dtype)
    xx = jnp.broadcast_to(xx, (N, 1, H, W)).astype(x.dtype)
    return jnp.concatenate([x, yy, xx], axis=1)


if __name__ == "__main__":
    key = jax.random.PRNGKey(0)
    N, C, H, W = 2, 4, 16, 16
    x = jax.random.normal(key, (N, C, H, W), dtype=jnp.float32)

    out = add_coords(x)
    out = jax.block_until_ready(out)

    ref = add_coords_ref(x)
    assert out.shape == (N, C + 2, H, W), out.shape
    assert jnp.allclose(out, ref, atol=1e-6, rtol=1e-6), "mismatch vs reference"

    print("KERNEL_OK")
</pallas_src>

<mosaic_0001>
module attributes {stable_mosaic.version = 11 : i64} {
  func.func @_addcoords_kernel(%arg0: i32, %arg1: i32, %arg2: memref<1x4x256xf32, #tpu.memory_space<vmem>>, %arg3: memref<1x6x256xf32, #tpu.memory_space<vmem>>) attributes {dimension_semantics = [#tpu.dimension_semantics<parallel>, #tpu.dimension_semantics<parallel>], iteration_bounds = array<i64: 2, 1>, scalar_prefetch = 0 : i64, scratch_operands = 0 : i64, tpu.core_type = #tpu.core_type<tc>, window_params = [{transform_indices = @transform_0, window_bounds = array<i64: 1, 4, 256>}, {transform_indices = @transform_1, window_bounds = array<i64: 1, 6, 256>}]} {
    %c0 = arith.constant 0 : index
    %c0_0 = arith.constant 0 : index
    %c0_1 = arith.constant 0 : index
    %0 = vector.load %arg2[%c0, %c0_0, %c0_1] : memref<1x4x256xf32, #tpu.memory_space<vmem>>, vector<1x4x256xf32>
    %c0_2 = arith.constant 0 : index
    %c0_3 = arith.constant 0 : index
    %c0_4 = arith.constant 0 : index
    %1 = vector.load %arg3[%c0_2, %c0_3, %c0_4] : memref<1x6x256xf32, #tpu.memory_space<vmem>>, vector<1x4x256xf32>
    tpu.vector_store %arg3[%c0_2, %c0_3, %c0_4], %0 {strides = array<i32>} : memref<1x6x256xf32, #tpu.memory_space<vmem>>, vector<1x4x256xf32>,
    %2 = tpu.iota {dimensions = array<i32: 1>} : vector<1x256xi32>
    %c256_i32 = arith.constant 256 : i32
    %3 = arith.muli %arg1, %c256_i32 : i32
    %4 = vector.broadcast %3 : i32 to vector<1x256xi32>
    %5 = arith.addi %2, %4 : vector<1x256xi32>
    %6 = arith.sitofp %5 : vector<1x256xi32> to vector<1x256xf32>
    %cst = arith.constant 1.600000e+01 : f32
    %7 = vector.broadcast %cst : f32 to vector<1x256xf32>
    %8 = arith.divf %6, %7 : vector<1x256xf32>
    %9 = math.floor %8 : vector<1x256xf32>
    %cst_5 = arith.constant 1.600000e+01 : f32
    %10 = vector.broadcast %cst_5 : f32 to vector<1x256xf32>
    %11 = arith.mulf %9, %10 : vector<1x256xf32>
    %12 = arith.subf %6, %11 : vector<1x256xf32>
    %cst_6 = arith.constant 1.500000e+01 : f32
    %13 = vector.broadcast %cst_6 : f32 to vector<1x256xf32>
    %14 = arith.divf %9, %13 : vector<1x256xf32>
    %cst_7 = arith.constant 2.000000e+00 : f32
    %15 = vector.broadcast %cst_7 : f32 to vector<1x256xf32>
    %16 = arith.mulf %14, %15 : vector<1x256xf32>
    %cst_8 = arith.constant 1.000000e+00 : f32
    %17 = vector.broadcast %cst_8 : f32 to vector<1x256xf32>
    %18 = arith.subf %16, %17 : vector<1x256xf32>
    %cst_9 = arith.constant 1.500000e+01 : f32
    %19 = vector.broadcast %cst_9 : f32 to vector<1x256xf32>
    %20 = arith.divf %12, %19 : vector<1x256xf32>
    %cst_10 = arith.constant 2.000000e+00 : f32
    %21 = vector.broadcast %cst_10 : f32 to vector<1x256xf32>
    %22 = arith.mulf %20, %21 : vector<1x256xf32>
    %cst_11 = arith.constant 1.000000e+00 : f32
    %23 = vector.broadcast %cst_11 : f32 to vector<1x256xf32>
    %24 = arith.subf %22, %23 : vector<1x256xf32>
    %c0_12 = arith.constant 0 : index
    %c4 = arith.constant 4 : index
    %c0_13 = arith.constant 0 : index
    %25 = vector.load %arg3[%c0_12, %c4, %c0_13] : memref<1x6x256xf32, #tpu.memory_space<vmem>>, vector<1x1x256xf32>
    %26 = vector.shape_cast %25 : vector<1x1x256xf32> to vector<1x256xf32>
    %27 = vector.shape_cast %18 : vector<1x256xf32> to vector<1x1x256xf32>
    tpu.vector_store %arg3[%c0_12, %c4, %c0_13], %27 {strides = array<i32>} : memref<1x6x256xf32, #tpu.memory_space<vmem>>, vector<1x1x256xf32>,
    %c0_14 = arith.constant 0 : index
    %c5 = arith.constant 5 : index
    %c0_15 = arith.constant 0 : index
    %28 = vector.load %arg3[%c0_14, %c5, %c0_15] : memref<1x6x256xf32, #tpu.memory_space<vmem>>, vector<1x1x256xf32>
    %29 = vector.shape_cast %28 : vector<1x1x256xf32> to vector<1x256xf32>
    %30 = vector.shape_cast %24 : vector<1x256xf32> to vector<1x1x256xf32>
    tpu.vector_store %arg3[%c0_14, %c5, %c0_15], %30 {strides = array<i32>} : memref<1x6x256xf32, #tpu.memory_space<vmem>>, vector<1x1x256xf32>,
    return
  }
  func.func @transform_0(%arg0: i32, %arg1: i32) -> (i32, i32, i32) {
    %c0_i32 = arith.constant 0 : i32
    %c0_i32_0 = arith.constant 0 : i32
    return %arg0, %c0_i32, %arg1 : i32, i32, i32
  }
  func.func @transform_1(%arg0: i32, %arg1: i32) -> (i32, i32, i32) {
    %c0_i32 = arith.constant 0 : i32
    %c0_i32_0 = arith.constant 0 : i32
    return %arg0, %c0_i32, %arg1 : i32, i32, i32
  }
}

</mosaic_0001>

<bundles_post_ra>
// kernel: tpu_custom_call.1
= control target key start
LH: loop header
LB: loop body
LE: loop exit
PB: predicated region body
PF: predicated region fallthrough
CT: control target
= control target key end

     0   :  { %6 = vsyncpa [#allocation3], 0  ;;  %s617_s0 = inlined_call_operand.hbm [shape: f32[2,4,256], index: 0, kind: input, shape index: {}]   ;;  %s618_s1 = inlined_call_operand.vmem [shape: f32[2,6,256], index: 1, kind: output, shape index: {}]  }
   0x1   :  { %8 = vsyncpa [#allocation3 + $0x1], 0  ;;  %s511_s6 = smov 0   ;;  %s513_s7 = smov 0  }
   0x2   :  { %s515_s8 = smov 0   ;;  %s517_s9 = smov 0  }
   0x3   :  { %s519_s10 = smov 0   ;;  %s521_s11 = smov 0  }
   0x4 LB: > { %s341_s12 = sadd.s32 4294967295, %s497_s11   ;;  %s26_s13 = sadd.s32 1, %s493_s10  ;;  %s497_s11 = sphi %s521_s11, %s14_s11   ;;  %s493_s10 = sphi %s519_s10, %s626_s10   ;;  %s489_s9 = sphi %s517_s9, %s625_s9   ;;  %s485_s8 = sphi %s515_s8, %s624_s8   ;;  %s481_s7 = sphi %s513_s7, %s623_s7   ;;  %s477_s6 = sphi %s511_s6, %s622_s6  }
   0x5   : > { %p28_p0 = scmp.ge.s32.totalorder %s26_s13, 2  ;;  %s35_s14 = sadd.s32 1, %s485_s8 }
   0x6   : > { %p42_p1 = scmp.ne.s32.totalorder %s485_s8, %s481_s7  ;;  %p43_p2 = scmp.eq.s32.totalorder %s497_s11, 0 }
   0x7   : > { %s628_s13 = smov (%p28_p0, %s26_s13), 0  ;;  %p48_p4 = scmp.ne.s32.totalorder %s481_s7, %s477_s6 }
   0x8   : > { %p547_p3 = por %p43_p2, %p42_p1  ;;  %s30_s16 = ssub.s32 %s493_s10, %s628_s13 }
   0x9   : > { %p49_p5 = scmp.eq.s32.totalorder %s341_s12, 0  ;;  %p33_p6 = scmp.eq.s32.totalorder %s30_s16, 0 }
   0xa   : > { %p368_p8 = scmp.lt.s32.totalorder %s497_s11, 2  ;;  %s100_s19 = sand.u32 1, %s485_s8  }
   0xb   : > { %p554_p7 = por %p49_p5, %p48_p4  ;;  %s360_s20 = sshll.u32 %s493_s10, 7 }
   0xc   : > { %s560_s18 = scalar_select %p33_p6, %s485_s8, %s35_s14  }
   0xd   : > { %s345_s21 = sshll.u32 %s100_s19, 3  ;;  %s112_s24 = scalar_lea.hbm %s617_s0, %s360_s20 }
   0xe   : > { %s104_s25 = scalar_lea.vmem [#allocation2], %s345_s21  ;;  %p569_p9 = pnand %p368_p8, %p547_p3 }
   0xf   : > { %s114_s26 = sshll.u32 %s104_s25, 4  ;;  %p348_p10 = scmp.ge.s32.totalorder %s497_s11, 1  ;;  %s115_s26 = int_to_ptr.vmem [resolvable:$true] %s114_s26 }
  0x10   : > { %p119_p11 = scmp.lt.s32.totalorder %s497_s11, 3  ;;  %s101_s28 = scalar_lea.sflag [#allocation3], %s100_s19 }
  0x11   : > { %p421_p12 = pneg %p569_p9  ;;  %s432_s29 = scalar_lea.vmem %s115_s26, 128 }
  0x12   : > { %p433_p13 = scmp.ne.s32.totalorder %s115_s26, %s432_s29  ;;  %s499_s30 = smov [#allocation2]  }
  0x13   : > { %s437_s2 = sshll.u32 %s499_s30, 4  ;;  %s438_s2 = int_to_ptr.vmem [resolvable:$false] %s437_s2 }
  0x14   : > { %p435_p0 = pnand %p433_p13, %p421_p12  ;;  %s439_s3 = scalar_lea.vmem %s438_s2, 256 }
  0x15   : > { %p440_p2 = scmp.lt.s32.totalorder %s115_s26, %s438_s2  ;;  %p441_p3 = scmp.lt.s32.totalorder %s439_s3, %s432_s29 }
  0x16   : > { %p436_p1 = pneg %p435_p0 }
  0x17   : > { %p442_p4 = por %p441_p3, %p440_p2 }
  0x19   : > { %p443_p5 = pnand %p442_p4, %p436_p1 }
  0x1b   : > { %446 = shalt.err (!%p443_p5)
}
  0x1c   : > { %367 = dma.hbm_to_vmem [thread:$0]  (!%p569_p9), %s112_s24, 128, %s115_s26, %s101_s28  }
  0x1d   : > { %p120_p6 = pnand %p348_p10, %p119_p11 }
  0x1e   : > { %s125_s4 = sand.u32 (!%p120_p6), 1, %s481_s7  }
  0x1f   : > { %123 = sbr.rel (%p120_p6) target bundleno = 66 (0x42), region = 24  ;;  %s349_s5 = sshll.u32 (!%p120_p6), %s125_s4, 3 }
  0x20   : > { %s126_s6 = scalar_lea.sflag (!%p120_p6), [#allocation3], %s125_s4  ;;  %s129_s12 = scalar_lea.vmem (!%p120_p6), [#allocation2], %s349_s5 }
  0x24   : > { %472 = dma.done.wait (%p554_p7), %s126_s6, 128  }
  0x25   : > { %474 = vsyncadd (%p554_p7), %s126_s6, 4294967168  ;;  %p154_p8 = scmp.lt.s32.totalorder %s489_s9, 1  ;;  %v169_v0 = vlaneseq  ;;  %v163_v6 = vld [vmem:[%s129_s12] sm:$0xff]  ;;  %v500_v7 = vmov 1966171168  }
  0x26   : > { %v204_v8 = vunpack.c.l.s4 %v500_v7  ;;  %v165_v9 = vcombine.high %v163_v6, %v163_v6 }
  0x27   : > { %s630_s9 = smov (!%p154_p8, %s489_s9), 1  ;;  %v170_v1 = vand.u32 127, %v169_v0  ;;  %v207_v16 = vshrl.u32 %v169_v0, 7  ;;  %vm220_vm0 = vcmp.lt.s32.totalorder %v169_v0, 256 }
  0x28   : > { %s361_s14 = sshll.u32 %s630_s9, 4  ;;  %v205_v15 = vunpack.c.0.s8 %v204_v8 }
  0x29   : > { %v171_v2 = vadd.s32 128, %v170_v1  ;;  %v176_v3 = vcvt.s32.f32 %v170_v1  ;;  %s593_s19 = scalar_lea.vmem %s618_s1, %s361_s14 }
  0x2a   : > { %167 = vst [vmem:[%s593_s19] sm:$0xf] %v163_v6  ;;  %168 = vst [vmem:[%s593_s19 + $0x8] sm:$0xf] %v165_v9  ;;  %v208_v26 = vsub.s32 %v205_v15, %v207_v16 }
  0x2b   : > { %v177_v4 = vcvt.s32.f32 %v171_v2  ;;  %v179_v5 = vmul.f32 0.0625, %v176_v3 }
  0x2d   : > { %v180_v10 = vmul.f32 0.0625, %v177_v4  ;;  %v181_v11 = vfloor.f32 %v179_v5 }
  0x2f   : > { %v182_v12 = vfloor.f32 %v180_v10  ;;  %v188_v13 = vmul.f32 0.06666667, %v181_v11  ;;  %v183_v14 = vmul.f32 16.0, %v181_v11 }
  0x31   : > { %v189_v17 = vmul.f32 0.06666667, %v182_v12  ;;  %v190_v18 = vmul.f32 2.0, %v188_v13  ;;  %v184_v19 = vmul.f32 16.0, %v182_v12  ;;  %v185_v20 = vsub.f32 %v176_v3, %v183_v14 }
  0x33   : > { %v191_v21 = vmul.f32 2.0, %v189_v17  ;;  %v352_v22 = vadd.f32 -1.0, %v190_v18  ;;  %v186_v23 = vsub.f32 %v177_v4, %v184_v19  ;;  %v194_v24 = vmul.f32 0.06666667, %v185_v20 }
  0x35   : > { %v353_v25 = vadd.f32 -1.0, %v191_v21  ;;  %v195_v27 = vmul.f32 0.06666667, %v186_v23  ;;  %v196_v28 = vmul.f32 2.0, %v194_v24 }
  0x37   : > { %v202_v29 = vcombine.low %v352_v22, %v353_v25  ;;  %v197_v30 = vmul.f32 2.0, %v195_v27  ;;  %v354_v31 = vadd.f32 -1.0, %v196_v28 }
  0x39   : > { %v209_v32 = vrot.slane %v202_v29, %v208_v26  ;;  %v355_v33 = vadd.f32 -1.0, %v197_v30 }
  0x3b   : > { %v216_v34 = vrot.slane %v209_v32, %v208_v26  ;;  %v227_v35 = vcombine.low %v354_v31, %v355_v33 }
  0x3d   : > { %356 = vst.msk [vmem:[%s593_s19 + $0x4] ss:$8 sm:$0x3] %vm220_vm0, %v216_v34  ;;  %v234_v36 = vrot.slane %v227_v35, %v208_v26 }
  0x3f   : > { %v241_v37 = vrot.slane %v234_v36, %v208_v26 }
  0x41   : > { %357 = vst.msk [vmem:[%s593_s19 + $0x5] ss:$8 sm:$0x3] %vm220_vm0, %v241_v37 }
  0x42 PF: > { %s14_s11 = sadd.s32 1, %s497_s11   ;;  %s622_s6 = smov %s481_s7 }
  0x43   : > { %p11_p7 = scmp.ge.s32.totalorder %s14_s11, 4   ;;  %s623_s7 = smov %s485_s8 }
  0x44   : > { %s624_s8 = smov %s560_s18  ;;  %s625_s9 = smov %s493_s10 }
  0x45   : > { %s626_s10 = smov %s628_s13  ;;  %13 = sbr.rel (!%p11_p7) target bundleno = 4 (0x4), region = 66 }
  0x4a   :  { %276 = vsyncpa [#allocation3], 1 }
  0x4b   :  { %278 = vsyncpa [#allocation3 + $0x1], 1 }

</bundles_post_ra>
